<compile_context>
chip_gen: v7x
topology: tpu7x:2x2x1
jax: 0.10.0
libtpu: 0.0.40
codegen_flags: <defaults>
</compile_context>

<pallas_src>
import functools

import jax
import jax.numpy as jnp
from jax.experimental import pallas as pl
from jax.experimental.pallas import tpu as pltpu


def _round_up(x, m):
    return (x + m - 1) // m * m


def _fused_conv_kernel(emb_ref, w_ref, b_ref, mask_ref, out_ref, *,
                       max_fs, tn, s_pad, d, f_total):
    # emb_ref : (TN*S_pad, D)         flattened tile of TN time-padded sequences
    # w_ref   : (max_fs*D, F_total)   packed conv weights, row index = tap*D + d (zero taps
    #                                 for filters shorter than max_fs)
    # b_ref   : (1, F_total)          packed biases
    # mask_ref: (S_pad, F_total)      0 where the conv position is valid for that filter,
    #                                 -BIG otherwise
    # out_ref : (TN, F_total)
    emb = emb_ref[...]                                            # (R, D)
    r = tn * s_pad

    # Build the sliding-window matrix: lane block i holds the rows rotated up by i
    # (row t of block i == emb[(t + i) mod R]).  Wrap-around rows only land on time
    # positions t_local >= S_pad - (max_fs - 1) >= S, which the mask removes, so the
    # rotation needs no zero fill.
    parts = [emb]
    for i in range(1, max_fs):
        parts.append(jnp.concatenate([emb[i:, :], emb[:i, :]], axis=0))
    win = jnp.concatenate(parts, axis=1)                          # (R, max_fs*D)

    # One wide MXU matmul for all filter sizes / taps at once.
    acc = jnp.dot(win, w_ref[...], preferred_element_type=jnp.float32)   # (R, F_total)

    # Per-sequence masked max over time (k=1 pooling), then bias + ReLU.
    scores = acc.reshape(tn, s_pad, f_total) + mask_ref[...][None, :, :]
    pooled = jnp.max(scores, axis=1)                              # (TN, F_total)
    out_ref[...] = jnp.maximum(pooled + b_ref[...], 0.0).astype(out_ref.dtype)


def _pack_weights(conv_weights, max_fs, d):
    """conv_weights[j]: (F, 1, fs_j, D) -> packed (max_fs*D, F_total), row = tap*D + d."""
    cols = []
    for w in conv_weights:
        fs = w.shape[2]
        wt = jnp.transpose(w[:, 0], (1, 2, 0)).astype(jnp.float32)    # (fs, D, F)
        wt = jnp.pad(wt, ((0, max_fs - fs), (0, 0), (0, 0)))           # zero taps beyond fs
        cols.append(wt)
    packed = jnp.concatenate(cols, axis=-1)                            # (max_fs, D, F_total)
    return packed.reshape(max_fs * d, -1)


def _build_mask(filter_sizes, n_filters, s, s_pad):
    """(S_pad, F_total) additive mask: 0 where t < S - fs + 1, -BIG elsewhere."""
    neg = jnp.float32(-1e30)
    t = jnp.arange(s_pad, dtype=jnp.int32)[:, None]                    # (S_pad, 1)
    cols = []
    for fs in filter_sizes:
        l_out = s - fs + 1
        valid = t < l_out
        cols.append(jnp.where(valid, 0.0, neg)
                    * jnp.ones((1, n_filters), jnp.float32))
    return jnp.concatenate(cols, axis=1).astype(jnp.float32)


def cnn_embedding_forward(dialogue, emb_weights, conv_weights, conv_biases, filter_sizes,
                          *, tile_rows=128):
    B, T, S = dialogue.shape
    N = B * T
    D = emb_weights.shape[1]
    n_filters = conv_weights[0].shape[0]
    f_total = n_filters * len(filter_sizes)
    max_fs = max(filter_sizes)

    # Time padding: every tap of every valid position stays inside a sequence's padded
    # extent, and S_pad is a multiple of 8 so the in-kernel reshape splits on a sublane
    # tile boundary.  Row padding: tile of TN sequences divides N_pad evenly.
    S_pad = _round_up(S + max_fs - 1, 8)
    TN = min(tile_rows, _round_up(N, 8))
    N_pad = _round_up(N, TN)

    # Pad the *indices* (with index 0 -> a valid embedding row; those positions are killed
    # by the mask), then do a single gather that directly emits the padded (N_pad,S_pad,D)
    # slab.  This avoids a second full-tensor pad copy through HBM.
    # TODO(synk): pull the gather itself into the kernel (scalar-prefetched indices + manual
    # DMA gather from an HBM-resident table) to avoid materializing the (N,S,D) intermediate.
    c_in = dialogue.reshape(N, S).astype(jnp.int32)
    c_pad = jnp.pad(c_in, ((0, N_pad - N), (0, S_pad - S)))
    embedded = jnp.take(emb_weights.astype(jnp.float32), c_pad, axis=0)  # (N_pad, S_pad, D)
    emb_flat = embedded.reshape(N_pad * S_pad, D)

    # One-time weight / bias / mask packing (hoisted out of the kernel).
    w_packed = _pack_weights(conv_weights, max_fs, D)                    # (max_fs*D, F_total)
    b_packed = jnp.concatenate(conv_biases).reshape(1, f_total).astype(jnp.float32)
    mask = _build_mask(filter_sizes, n_filters, S, S_pad)                # (S_pad, F_total)

    kernel = functools.partial(_fused_conv_kernel, max_fs=max_fs, tn=TN,
                               s_pad=S_pad, d=D, f_total=f_total)

    cost = pl.CostEstimate(
        flops=2 * N_pad * S_pad * (max_fs * D) * f_total,
        transcendentals=0,
        bytes_accessed=4 * (emb_flat.size + w_packed.size + b_packed.size
                            + mask.size + N_pad * f_total),
    )

    out = pl.pallas_call(
        kernel,
        out_shape=jax.ShapeDtypeStruct((N_pad, f_total), jnp.float32),
        grid=(N_pad // TN,),
        in_specs=[
            pl.BlockSpec((TN * S_pad, D), lambda n: (n, 0)),
            pl.BlockSpec((max_fs * D, f_total), lambda n: (0, 0)),
            pl.BlockSpec((1, f_total), lambda n: (0, 0)),
            pl.BlockSpec((S_pad, f_total), lambda n: (0, 0)),
        ],
        out_specs=pl.BlockSpec((TN, f_total), lambda n: (n, 0)),
        compiler_params=pltpu.CompilerParams(dimension_semantics=("parallel",)),
        cost_estimate=cost,
    )(emb_flat, w_packed, b_packed, mask)

    # TODO(synk): nn.Dropout is identity in eval mode; training-mode dropout not implemented.
    # TODO(synk): only the k=1 (max-over-time) DynamicKMaxPooling path is implemented.
    return out[:N]                                                       # (B*T, F_total)


def reference_forward(dialogue, emb_weights, conv_weights, conv_biases, filter_sizes):
    """Pure-JAX reference matching the PyTorch forward (eval mode, k=1)."""
    B, T, S = dialogue.shape
    c_in = dialogue.reshape(B * T, S)
    e = emb_weights[c_in]                                                # (N, S, D)
    outs = []
    for w, b, fs in zip(conv_weights, conv_biases, filter_sizes):
        l_out = S - fs + 1
        windows = jnp.stack([e[:, i:i + l_out, :] for i in range(fs)], axis=2)  # (N, L, fs, D)
        conv = jnp.einsum('ntid,fid->nft', windows, w[:, 0]) + b[None, :, None]
        conv = jax.nn.relu(conv)
        outs.append(jnp.max(conv, axis=2))
    return jnp.concatenate(outs, axis=1)


if __name__ == "__main__":
    # Small, module-consistent shapes.
    B, T, S = 2, 4, 16            # batch, timesteps, sent_len
    vocab, D = 50, 32             # num_embeddings, embedding_dim
    n_filters = 8
    filter_sizes = (2, 3, 4)

    key = jax.random.PRNGKey(0)
    k_emb, k_dlg, *k_convs = jax.random.split(key, 2 + 2 * len(filter_sizes))

    # Embedding weights (stand-in for weights_matrix).
    emb_weights = jax.random.normal(k_emb, (vocab, D), dtype=jnp.float32)

    # Conv weights: xavier_normal_ (as in init_weights); biases: PyTorch default uniform.
    conv_weights, conv_biases = [], []
    for idx, fs in enumerate(filter_sizes):
        kw, kb = k_convs[2 * idx], k_convs[2 * idx + 1]
        fan_in = 1 * fs * D
        fan_out = n_filters * fs * D
        std = (2.0 / (fan_in + fan_out)) ** 0.5
        w = std * jax.random.normal(kw, (n_filters, 1, fs, D), dtype=jnp.float32)
        bound = 1.0 / (fan_in ** 0.5)
        b = jax.random.uniform(kb, (n_filters,), minval=-bound, maxval=bound,
                               dtype=jnp.float32)
        conv_weights.append(w)
        conv_biases.append(b)

    dialogue = jax.random.randint(k_dlg, (B, T, S), 0, vocab, dtype=jnp.int32)

    out = cnn_embedding_forward(dialogue, emb_weights, conv_weights, conv_biases, filter_sizes)
    out = jax.block_until_ready(out)

    ref = reference_forward(dialogue, emb_weights, conv_weights, conv_biases, filter_sizes)
    assert out.shape == (B * T, n_filters * len(filter_sizes)), out.shape
    assert jnp.allclose(out, ref, atol=1e-4, rtol=1e-5), "mismatch vs reference"

    print("KERNEL_OK")
</pallas_src>

<mosaic_0001>
module attributes {stable_mosaic.version = 11 : i64} {
  func.func @_fused_conv_kernel(%arg0: i32, %arg1: memref<192x32xf32, #tpu.memory_space<vmem>>, %arg2: memref<128x24xf32, #tpu.memory_space<vmem>>, %arg3: memref<1x24xf32, #tpu.memory_space<vmem>>, %arg4: memref<24x24xf32, #tpu.memory_space<vmem>>, %arg5: memref<8x24xf32, #tpu.memory_space<vmem>>) attributes {dimension_semantics = [#tpu.dimension_semantics<parallel>], iteration_bounds = array<i64: 1>, scalar_prefetch = 0 : i64, scratch_operands = 0 : i64, tpu.core_type = #tpu.core_type<tc>, window_params = [{transform_indices = @transform_0, window_bounds = array<i64: 192, 32>}, {pipeline_mode = #tpu.pipeline_mode<synchronous>, transform_indices = @transform_1, window_bounds = array<i64: 128, 24>}, {pipeline_mode = #tpu.pipeline_mode<synchronous>, transform_indices = @transform_2, window_bounds = array<i64: 1, 24>}, {pipeline_mode = #tpu.pipeline_mode<synchronous>, transform_indices = @transform_3, window_bounds = array<i64: 24, 24>}, {transform_indices = @transform_4, window_bounds = array<i64: 8, 24>}]} {
    %c0 = arith.constant 0 : index
    %c0_0 = arith.constant 0 : index
    %0 = vector.load %arg1[%c0, %c0_0] : memref<192x32xf32, #tpu.memory_space<vmem>>, vector<192x32xf32>
    %1 = vector.extract_strided_slice %0 {offsets = [1, 0], sizes = [191, 32], strides = [1, 1]} : vector<192x32xf32> to vector<191x32xf32>
    %2 = vector.extract_strided_slice %0 {offsets = [0, 0], sizes = [1, 32], strides = [1, 1]} : vector<192x32xf32> to vector<1x32xf32>
    %3 = tpu.concatenate %1, %2 in 0 : vector<191x32xf32>, vector<1x32xf32> -> vector<192x32xf32>
    %4 = vector.extract_strided_slice %0 {offsets = [2, 0], sizes = [190, 32], strides = [1, 1]} : vector<192x32xf32> to vector<190x32xf32>
    %5 = vector.extract_strided_slice %0 {offsets = [0, 0], sizes = [2, 32], strides = [1, 1]} : vector<192x32xf32> to vector<2x32xf32>
    %6 = tpu.concatenate %4, %5 in 0 : vector<190x32xf32>, vector<2x32xf32> -> vector<192x32xf32>
    %7 = vector.extract_strided_slice %0 {offsets = [3, 0], sizes = [189, 32], strides = [1, 1]} : vector<192x32xf32> to vector<189x32xf32>
    %8 = vector.extract_strided_slice %0 {offsets = [0, 0], sizes = [3, 32], strides = [1, 1]} : vector<192x32xf32> to vector<3x32xf32>
    %9 = tpu.concatenate %7, %8 in 0 : vector<189x32xf32>, vector<3x32xf32> -> vector<192x32xf32>
    %10 = tpu.concatenate %0, %3, %6, %9 in 1 : vector<192x32xf32>, vector<192x32xf32>, vector<192x32xf32>, vector<192x32xf32> -> vector<192x128xf32>
    %c0_1 = arith.constant 0 : index
    %c0_2 = arith.constant 0 : index
    %11 = vector.load %arg2[%c0_1, %c0_2] : memref<128x24xf32, #tpu.memory_space<vmem>>, vector<128x24xf32>
    %cst = arith.constant dense<0.000000e+00> : vector<192x24xf32>
    %12 = tpu.matmul %10, %11, %cst {dimension_numbers = #tpu.dot_dimension_numbers<[1], [0], [0], [1], [0, 0, 1, 1], [], []>} : vector<192x128xf32>, vector<128x24xf32>, vector<192x24xf32> -> vector<192x24xf32>
    %13 = vector.shape_cast %12 : vector<192x24xf32> to vector<8x24x24xf32>
    %c0_3 = arith.constant 0 : index
    %c0_4 = arith.constant 0 : index
    %14 = vector.load %arg4[%c0_3, %c0_4] : memref<24x24xf32, #tpu.memory_space<vmem>>, vector<24x24xf32>
    %15 = vector.shape_cast %14 : vector<24x24xf32> to vector<1x24x24xf32>
    %16 = vector.broadcast %15 : vector<1x24x24xf32> to vector<8x24x24xf32>
    %17 = arith.addf %13, %16 : vector<8x24x24xf32>
    %cst_5 = arith.constant dense<0xFF800000> : vector<8x24xf32>
    %18 = vector.multi_reduction <maximumf>, %17, %cst_5 [1] : vector<8x24x24xf32> to vector<8x24xf32>
    %c0_6 = arith.constant 0 : index
    %c0_7 = arith.constant 0 : index
    %19 = vector.load %arg3[%c0_6, %c0_7] : memref<1x24xf32, #tpu.memory_space<vmem>>, vector<1x24xf32>
    %20 = vector.broadcast %19 : vector<1x24xf32> to vector<8x24xf32>
    %21 = arith.addf %18, %20 : vector<8x24xf32>
    %cst_8 = arith.constant 0.000000e+00 : f32
    %22 = vector.broadcast %cst_8 : f32 to vector<8x24xf32>
    %23 = arith.maximumf %21, %22 : vector<8x24xf32>
    %c0_9 = arith.constant 0 : index
    %c0_10 = arith.constant 0 : index
    %24 = vector.load %arg5[%c0_9, %c0_10] : memref<8x24xf32, #tpu.memory_space<vmem>>, vector<8x24xf32>
    tpu.vector_store %arg5[%c0_9, %c0_10], %23 {strides = array<i32>} : memref<8x24xf32, #tpu.memory_space<vmem>>, vector<8x24xf32>,
    return
  }
  func.func @transform_0(%arg0: i32) -> (i32, i32) {
    %c0_i32 = arith.constant 0 : i32
    %c0_i32_0 = arith.constant 0 : i32
    return %arg0, %c0_i32 : i32, i32
  }
  func.func @transform_1(%arg0: i32) -> (i32, i32) {
    %c0_i32 = arith.constant 0 : i32
    %c0_i32_0 = arith.constant 0 : i32
    %c0_i32_1 = arith.constant 0 : i32
    return %c0_i32, %c0_i32_0 : i32, i32
  }
  func.func @transform_2(%arg0: i32) -> (i32, i32) {
    %c0_i32 = arith.constant 0 : i32
    %c0_i32_0 = arith.constant 0 : i32
    %c0_i32_1 = arith.constant 0 : i32
    return %c0_i32, %c0_i32_0 : i32, i32
  }
  func.func @transform_3(%arg0: i32) -> (i32, i32) {
    %c0_i32 = arith.constant 0 : i32
    %c0_i32_0 = arith.constant 0 : i32
    %c0_i32_1 = arith.constant 0 : i32
    return %c0_i32, %c0_i32_0 : i32, i32
  }
  func.func @transform_4(%arg0: i32) -> (i32, i32) {
    %c0_i32 = arith.constant 0 : i32
    %c0_i32_0 = arith.constant 0 : i32
    return %arg0, %c0_i32 : i32, i32
  }
}

</mosaic_0001>

<bundles_post_ra>
// kernel: tpu_custom_call.1
= control target key start
LH: loop header
LB: loop body
LE: loop exit
PB: predicated region body
PF: predicated region fallthrough
CT: control target
= control target key end

     0   :  { %vm168_vm0 = vcmask 1044480   ;;  %vm66_vm1 = vcmask 1046528   ;;  %vm117_vm2 = vcmask 1045504   ;;  %s1263_s5 = smov 96   ;;  %s1264_s6 = smov 32   ;;  %s1891_s0 = inlined_call_operand.vmem [shape: f32[192,32], index: 0, kind: input, shape index: {}]   ;;  %s1892_s1 = inlined_call_operand.vmem [shape: f32[128,24], index: 1, kind: input, shape index: {}]   ;;  %s1893_s2 = inlined_call_operand.vmem [shape: f32[1,24], index: 2, kind: input, shape index: {}]   ;;  %s1894_s3 = inlined_call_operand.vmem [shape: f32[24,24], index: 3, kind: input, shape index: {}]   ;;  %s1895_s4 = inlined_call_operand.hbm [shape: f32[8,24], index: 4, kind: output, shape index: {}]  }
   0x1   :  { %v1295_v0 = vld [vmem:[%s1891_s0] sm:$0xff]  ;;  %v1300_v1 = vld [vmem:[%s1891_s0 + $0x8] sm:$0xff]  ;;  %v1305_v2 = vld [vmem:[%s1891_s0 + $0x10] sm:$0xff]  ;;  %s1265_s11 = smov 64  }
   0x2   :  { %v169_v3 = vrot.slane %v1295_v0, 3  ;;  %v170_v4 = vrot.slane %v1300_v1, 3  ;;  %v172_v5 = vrot.slane %v1305_v2, 3  ;;  %v67_v6 = vrot.slane %v1295_v0, 1  ;;  %v1314_v7 = vld [vmem:[%s1891_s0 + $0x18] sm:$0xff]  ;;  %v1321_v10 = vld [vmem:[%s1891_s0 + $0x60] sm:$0xff] }
   0x3   :  { %v68_v8 = vrot.slane %v1300_v1, 1  ;;  %v70_v9 = vrot.slane %v1305_v2, 1  ;;  %v1326_v11 = vld [vmem:[%s1891_s0 + $0x68] sm:$0xff]  ;;  %v72_v12 = vrot.slane %v1314_v7, 1  ;;  %v90_v15 = vrot.slane %v1321_v10, 1  ;;  %v1343_v21 = vld [vmem:[%s1891_s0 + $0x20] sm:$0xff] }
   0x4   :  { %v171_v13 = vsel %vm168_vm0, %v169_v3, %v170_v4  ;;  %v173_v14 = vsel %vm168_vm0, %v170_v4, %v172_v5  ;;  %v92_v16 = vrot.slane %v1326_v11, 1  ;;  %v1348_v22 = vld [vmem:[%s1891_s0 + $0x70] sm:$0xff]  ;;  %v118_v25 = vrot.slane %v1295_v0, 2  ;;  %v1373_v39 = vld [vmem:[%s1891_s0 + $0x28] sm:$0xff]  ;;  %v1378_v40 = vld [vmem:[%s1891_s0 + $0x78] sm:$0xff] }
   0x5   :  { %v1069_v17 = vpack.i.bf16 %v173_v14, %v171_v13  ;;  %v69_v18 = vsel %vm66_vm1, %v67_v6, %v68_v8  ;;  %v71_v19 = vsel %vm66_vm1, %v68_v8, %v70_v9  ;;  %v73_v20 = vsel %vm66_vm1, %v70_v9, %v72_v12  ;;  %v1404_v59 = vld [vmem:[%s1891_s0 + $0x30] sm:$0xff]  ;;  %v1409_v60 = vld [vmem:[%s1891_s0 + $0x80] sm:$0xff] }
   0x6   :  { %v1059_v23 = vpack.i.bf16 %v71_v19, %v69_v18  ;;  %v93_v24 = vsel %vm66_vm1, %v90_v15, %v92_v16  ;;  %v119_v26 = vrot.slane %v1300_v1, 2  ;;  %v121_v28 = vrot.slane %v1305_v2, 2 }
   0x7   :  { %1070 = vrot.lane.b32.xlu1 %v1069_v17, %s1263_s5  ;;  %v1074_v27 = vpack.i.bf16 %v93_v24, %v73_v20  ;;  %v123_v29 = vrot.slane %v1314_v7, 2  ;;  %v141_v30 = vrot.slane %v1321_v10, 2  ;;  %v143_v32 = vrot.slane %v1326_v11, 2 }
   0x8   :  { %1060 = vrot.lane.b32.xlu0 %v1059_v23, %s1264_s6  ;;  %v120_v31 = vsel %vm117_vm2, %v118_v25, %v119_v26  ;;  %v74_v33 = vrot.slane %v1343_v21, 1  ;;  %v94_v34 = vrot.slane %v1348_v22, 1  ;;  %v122_v35 = vsel %vm117_vm2, %v119_v26, %v121_v28 }
   0x9   :  { %v124_v36 = vsel %vm117_vm2, %v121_v28, %v123_v29  ;;  %v174_v37 = vrot.slane %v1314_v7, 3  ;;  %v192_v38 = vrot.slane %v1321_v10, 3  ;;  %v1064_v41 = vpack.i.bf16 %v122_v35, %v120_v31 }
   0xa   :  { %v144_v42 = vsel %vm117_vm2, %v141_v30, %v143_v32  ;;  %v75_v43 = vsel %vm66_vm1, %v72_v12, %v74_v33  ;;  %v95_v44 = vsel %vm66_vm1, %v92_v16, %v94_v34  ;;  %v194_v48 = vrot.slane %v1326_v11, 3 }
   0xb   :  { %1075 = vrot.lane.b32.xlu1 %v1074_v27, %s1264_s6  ;;  %v1084_v45 = vpack.i.bf16 %v144_v42, %v124_v36  ;;  %v1079_v46 = vpack.i.bf16 %v95_v44, %v75_v43  ;;  %v175_v47 = vsel %vm168_vm0, %v172_v5, %v174_v37  ;;  %v125_v49 = vrot.slane %v1343_v21, 2 }
   0xc   :  { %1065 = vrot.lane.b32.xlu0 %v1064_v41, %s1265_s11  ;;  %v145_v50 = vrot.slane %v1348_v22, 2  ;;  %v76_v51 = vrot.slane %v1373_v39, 1  ;;  %v96_v52 = vrot.slane %v1378_v40, 1  ;;  %v195_v53 = vsel %vm168_vm0, %v192_v38, %v194_v48 }
   0xd   :  { %v176_v54 = vrot.slane %v1343_v21, 3  ;;  %v196_v55 = vrot.slane %v1348_v22, 3  ;;  %v126_v56 = vsel %vm117_vm2, %v123_v29, %v125_v49  ;;  %v127_v58 = vrot.slane %v1373_v39, 2 }
   0xe   :  { %v146_v57 = vsel %vm117_vm2, %v143_v32, %v145_v50  ;;  %v1094_v61 = vpack.i.bf16 %v195_v53, %v175_v47  ;;  %v77_v62 = vsel %vm66_vm1, %v74_v33, %v76_v51  ;;  %v97_v63 = vsel %vm66_vm1, %v94_v34, %v96_v52 }
   0xf   :  { %1085 = vrot.lane.b32.xlu1 %v1084_v45, %s1265_s11 }
  0x10   :  { %9 = vsyncpa [#allocation3], 0  ;;  %1080 = vrot.lane.b32.xlu0 %v1079_v46, %s1264_s6  ;;  %v1089_v4 = vpack.i.bf16 %v146_v57, %v126_v56  ;;  %v147_v5 = vrot.slane %v1378_v40, 2  ;;  %v177_v8 = vsel %vm168_vm0, %v174_v37, %v176_v54  ;;  %v197_v9 = vsel %vm168_vm0, %v194_v48, %v196_v55  ;;  %v1430_v24 = vld [vmem:[%s1891_s0 + $0x38] sm:$0xff]  ;;  %v1436_v27 = vld [vmem:[%s1891_s0 + $0x88] sm:$0xff] }
  0x11   :  { %v78_v12 = vrot.slane %v1404_v59, 1  ;;  %v98_v13 = vrot.slane %v1409_v60, 1  ;;  %v1104_v14 = vpack.i.bf16 %v97_v63, %v77_v62  ;;  %v128_v16 = vsel %vm117_vm2, %v125_v49, %v127_v58  ;;  %v1453_v44 = vld [vmem:[%s1891_s0 + $0x40] sm:$0xff]  ;;  %v1458_v45 = vld [vmem:[%s1891_s0 + $0x90] sm:$0xff]  ;;  %v1474_v57 = vld [vmem:[%s1891_s0 + $0x48] sm:$0xff] }
  0x12   :  { %v178_v17 = vrot.slane %v1373_v39, 3  ;;  %v148_v18 = vsel %vm117_vm2, %v145_v50, %v147_v5  ;;  %v198_v19 = vrot.slane %v1378_v40, 3  ;;  %v129_v20 = vrot.slane %v1404_v59, 2 }
  0x13   :  { %1095 = vrot.lane.b32.xlu1 %v1094_v61, %s1263_s5  ;;  %v149_v23 = vrot.slane %v1409_v60, 2  ;;  %v1099_v26 = vpack.i.bf16 %v197_v9, %v177_v8  ;;  %v79_v28 = vsel %vm66_vm1, %v76_v51, %v78_v12  ;;  %v99_v29 = vsel %vm66_vm1, %v96_v52, %v98_v13 }
  0x14   :  { %1090 = vrot.lane.b32.xlu0 %v1089_v4, %s1265_s11  ;;  %v1114_v31 = vpack.i.bf16 %v148_v18, %v128_v16  ;;  %v179_v32 = vsel %vm168_vm0, %v176_v54, %v178_v17  ;;  %v80_v33 = vrot.slane %v1430_v24, 1  ;;  %v199_v34 = vsel %vm168_vm0, %v196_v55, %v198_v19 }
  0x15   :  { %v130_v35 = vsel %vm117_vm2, %v127_v58, %v129_v20  ;;  %v150_v36 = vsel %vm117_vm2, %v147_v5, %v149_v23  ;;  %v100_v37 = vrot.slane %v1436_v27, 1  ;;  %v1109_v41 = vpack.i.bf16 %v99_v29, %v79_v28  ;;  %v1479_v58 = vld [vmem:[%s1891_s0 + $0x98] sm:$0xff] }
  0x16   :  { %v180_v42 = vrot.slane %v1404_v59, 3  ;;  %v200_v43 = vrot.slane %v1409_v60, 3  ;;  %v1124_v46 = vpack.i.bf16 %v199_v34, %v179_v32  ;;  %v1119_v47 = vpack.i.bf16 %v150_v36, %v130_v35 }
  0x17   :  { %1105 = vrot.lane.b32.xlu1 %v1104_v14, %s1264_s6  ;;  %v81_v48 = vsel %vm66_vm1, %v78_v12, %v80_v33  ;;  %v101_v49 = vsel %vm66_vm1, %v98_v13, %v100_v37  ;;  %v131_v50 = vrot.slane %v1430_v24, 2  ;;  %v151_v51 = vrot.slane %v1436_v27, 2 }
  0x18   :  { %1100 = vrot.lane.b32.xlu0 %v1099_v26, %s1263_s5  ;;  %v181_v52 = vsel %vm168_vm0, %v178_v17, %v180_v42  ;;  %v201_v53 = vsel %vm168_vm0, %v198_v19, %v200_v43  ;;  %v82_v54 = vrot.slane %v1453_v44, 1  ;;  %v102_v55 = vrot.slane %v1458_v45, 1  ;;  %v1503_v26 = vld [vmem:[%s1891_s0 + $0xa0] sm:$0xff] }
  0x19   :  { %v182_v56 = vrot.slane %v1430_v24, 3  ;;  %v1134_v61 = vpack.i.bf16 %v101_v49, %v81_v48  ;;  %v1129_v62 = vpack.i.bf16 %v201_v53, %v181_v52  ;;  %v132_v63 = vsel %vm117_vm2, %v129_v20, %v131_v50  ;;  %v513_v48 = vld [vmem:[%s1892_s1] sm:$0xff]  ;;  %v514_v49 = vld [vmem:[%s1892_s1 + $0x8] sm:$0xff] }
  0x1a   :  { %v152_v4 = vsel %vm117_vm2, %v149_v23, %v151_v51  ;;  %v83_v5 = vsel %vm66_vm1, %v80_v33, %v82_v54  ;;  %v103_v8 = vsel %vm66_vm1, %v100_v37, %v102_v55  ;;  %v202_v9 = vrot.slane %v1436_v27, 3  ;;  %v1498_v23 = vld [vmem:[%s1891_s0 + $0x50] sm:$0xff] }
  0x1b   :  { %1115 = vrot.lane.b32.xlu1 %v1114_v31, %s1265_s11  ;;  %v133_v12 = vrot.slane %v1453_v44, 2  ;;  %v153_v13 = vrot.slane %v1458_v45, 2  ;;  %v84_v14 = vrot.slane %v1474_v57, 1  ;;  %v104_v16 = vrot.slane %v1479_v58, 1 }
  0x1c   :  { %1110 = vrot.lane.b32.xlu0 %v1109_v41, %s1264_s6  ;;  %v184_v17 = vrot.slane %v1453_v44, 3  ;;  %v204_v18 = vrot.slane %v1458_v45, 3  ;;  %v1144_v19 = vpack.i.bf16 %v152_v4, %v132_v63  ;;  %v1139_v20 = vpack.i.bf16 %v103_v8, %v83_v5  ;;  %v1550_v63 = vld [vmem:[%s1891_s0 + $0xb8] sm:$0xff] }
  0x1d   :  { %v183_v28 = vsel %vm168_vm0, %v180_v42, %v182_v56  ;;  %v203_v29 = vsel %vm168_vm0, %v200_v43, %v202_v9  ;;  %v134_v31 = vsel %vm117_vm2, %v131_v50, %v133_v12  ;;  %v135_v32 = vrot.slane %v1474_v57, 2 }
  0x1e   :  { %v154_v33 = vsel %vm117_vm2, %v151_v51, %v153_v13  ;;  %v85_v34 = vsel %vm66_vm1, %v82_v54, %v84_v14  ;;  %v105_v35 = vsel %vm66_vm1, %v102_v55, %v104_v16  ;;  %v185_v36 = vsel %vm168_vm0, %v182_v56, %v184_v17 }
  0x1f   :  { %1125 = vrot.lane.b32.xlu1 %v1124_v46, %s1263_s5  ;;  %v205_v37 = vsel %vm168_vm0, %v202_v9, %v204_v18  ;;  %v155_v41 = vrot.slane %v1479_v58, 2  ;;  %v86_v42 = vrot.slane %v1498_v23, 1  ;;  %v106_v43 = vrot.slane %v1503_v26, 1 }
  0x20   :  { %1120 = vrot.lane.b32.xlu0 %v1119_v47, %s1265_s11  ;;  %v1154_v46 = vpack.i.bf16 %v203_v29, %v183_v28  ;;  %v1149_v47 = vpack.i.bf16 %v154_v33, %v134_v31  ;;  %v1164_v50 = vpack.i.bf16 %v105_v35, %v85_v34  ;;  %v1159_v51 = vpack.i.bf16 %v205_v37, %v185_v36  ;;  %v517_v28 = vld [vmem:[%s1892_s1 + $0x20] sm:$0xff]  ;;  %v518_v29 = vld [vmem:[%s1892_s1 + $0x28] sm:$0xff] }
  0x21   :  { %v186_v52 = vrot.slane %v1474_v57, 3  ;;  %v136_v53 = vsel %vm117_vm2, %v133_v12, %v135_v32  ;;  %v156_v54 = vsel %vm117_vm2, %v153_v13, %v155_v41  ;;  %v87_v55 = vsel %vm66_vm1, %v84_v14, %v86_v42  ;;  %v515_v12 = vld [vmem:[%s1892_s1 + $0x10] sm:$0xff]  ;;  %v516_v13 = vld [vmem:[%s1892_s1 + $0x18] sm:$0xff]  ;;  %v1579_v34 = vld [vmem:[%s1891_s0 + $0xa8] sm:$0xff] }
  0x22   :  { %v107_v56 = vsel %vm66_vm1, %v104_v16, %v106_v43  ;;  %v163_v5 = vrot.slane %v1550_v63, 2  ;;  %v214_v8 = vrot.slane %v1550_v63, 3  ;;  %v1007_v9 = vpack.c.bf16 %v514_v49, %v513_v48 }
  0x23   :  { %1135 = vrot.lane.b32.xlu1 %v1134_v61, %s1264_s6  ;;  %v1540_v61 = vld [vmem:[%s1891_s0 + $0x58] sm:$0xff]  ;;  %v206_v14 = vrot.slane %v1479_v58, 3  ;;  %v137_v16 = vrot.slane %v1498_v23, 2  ;;  %v1174_v31 = vpack.i.bf16 %v156_v54, %v136_v53  ;;  %v187_v33 = vsel %vm168_vm0, %v184_v17, %v186_v52 }
  0x24   :  { %1130 = vrot.lane.b32.xlu0 %v1129_v62, %s1263_s5  ;;  %v1545_v62 = vld [vmem:[%s1891_s0 + $0xb0] sm:$0xff]  ;;  %v88_v35 = vrot.slane %v1540_v61, 1  ;;  %1008 = vmatprep.subr.bf16.mxu0 %v1007_v9  ;;  %v1169_v37 = vpack.i.bf16 %v107_v56, %v87_v55  ;;  %v1011_v49 = vpack.c.bf16 %v516_v13, %v515_v12  ;;  %v1015_v53 = vpack.c.bf16 %v518_v29, %v517_v28  ;;  %v521_v29 = vld [vmem:[%s1892_s1 + $0x40] sm:$0xff] }
  0x25   :  { %v161_v4 = vrot.slane %v1545_v62, 2  ;;  %1010 = vmatpush3.bf16.msra.mxu0 %v1007_v9  ;;  %v207_v54 = vsel %vm168_vm0, %v204_v18, %v206_v14  ;;  %1039 = vmatprep.subr.bf16.mxu1 %v1007_v9  ;;  %v519_v56 = vld [vmem:[%s1892_s1 + $0x30] sm:$0xff]  ;;  %v159_v28 = vrot.slane %v1579_v34, 2  ;;  %vm438_vm3 = vcmask 261120  }
  0x26   :  { %1012 = vmatprep.subr.bf16.mxu0 %v1011_v49  ;;  %1047 = vmatpush3.bf16.msra.mxu1 %v1007_v9  ;;  %v1184_v18 = vpack.i.bf16 %v207_v54, %v187_v33  ;;  %v89_v12 = vsel %vm66_vm1, %v86_v42, %v88_v35  ;;  %v139_v9 = vrot.slane %v1540_v61, 2  ;;  %v190_v54 = vrot.slane %v1540_v61, 3 }
  0x27   :  { %1145 = vrot.lane.b32.xlu1 %v1144_v19, %s1265_s11  ;;  %v157_v19 = vrot.slane %v1503_v26, 2  ;;  %v1585_v36 = vsel %vm117_vm2, %v161_v4, %v163_v5  ;;  %1040 = vmatprep.subr.bf16.mxu1 %v1011_v49  ;;  %vm463_vm4 = vcmask 523264   ;;  %vm488_vm5 = vcmask 785408  }
  0x28   :  { %1140 = vrot.lane.b32.xlu0 %v1139_v20, %s1264_s6  ;;  %v212_v20 = vrot.slane %v1545_v62, 3  ;;  %vm741_vm6 = vcmask 195584   ;;  %vm862_vm7 = vcmask 1041409   ;;  %vm865_vm8 = vcmask 1042434  }
  0x29   :  { %v158_v55 = vsel %vm117_vm2, %v155_v41, %v157_v19  ;;  %1014 = vmatpush3.bf16.msra.mxu0 %v1011_v49  ;;  %vm868_vm9 = vcmask 1043459   ;;  %vm871_vm10 = vcmask 1044484   ;;  %vm874_vm11 = vcmask 1045509  }
  0x2a   :  { %v1595_v17 = vsel %vm168_vm0, %v212_v20, %v214_v8  ;;  %1016 = vmatprep.subr.bf16.mxu0 %v1015_v53  ;;  %1048 = vmatpush3.bf16.msra.mxu1 %v1011_v49  ;;  %v523_v49 = vld [vmem:[%s1892_s1 + $0x50] sm:$0xff]  ;;  %vm877_vm12 = vcmask 1046534   ;;  %vm880_vm13 = vcmask 1047559  }
  0x2b   :  { %1155 = vrot.lane.b32.xlu1 %v1154_v46, %s1263_s5  ;;  %v1590_v46 = vsel %vm117_vm2, %v163_v5, %v118_v25  ;;  %v520_v5 = vld [vmem:[%s1892_s1 + $0x38] sm:$0xff]  ;;  %1041 = vmatprep.subr.bf16.mxu1 %v1015_v53 }
  0x2c   :  { %1150 = vrot.lane.b32.xlu0 %v1149_v47, %s1265_s11  ;;  %v1600_v47 = vsel %vm168_vm0, %v214_v8, %v169_v3  ;;  %v1229_v48 = vpack.i.bf16 %v1590_v46, %v1585_v36  ;;  %v138_v3 = vsel %vm117_vm2, %v135_v32, %v137_v16  ;;  %v208_v8 = vrot.slane %v1503_v26, 3 }
  0x2d   :  { %v1234_v25 = vpack.i.bf16 %v1600_v47, %v1595_v17  ;;  %v1179_v32 = vpack.i.bf16 %v158_v55, %v138_v3  ;;  %v1019_v41 = vpack.c.bf16 %v520_v5, %v519_v56  ;;  %1018 = vmatpush3.bf16.msra.mxu0 %v1015_v53  ;;  %v140_v56 = vsel %vm117_vm2, %v137_v16, %v139_v9  ;;  %v524_v5 = vld [vmem:[%s1892_s1 + $0x58] sm:$0xff] }
  0x2e   :  { %v209_v33 = vsel %vm168_vm0, %v206_v14, %v208_v8  ;;  %v210_v14 = vrot.slane %v1579_v34, 3  ;;  %1049 = vmatpush3.bf16.msra.mxu1 %v1015_v53  ;;  %v142_v53 = vsel %vm117_vm2, %v139_v9, %v141_v30  ;;  %v193_v9 = vsel %vm168_vm0, %v190_v54, %v192_v38 }
  0x2f   :  { %1165 = vrot.lane.b32.xlu1 %v1164_v50, %s1264_s6  ;;  %v108_v50 = vrot.slane %v1579_v34, 1  ;;  %1020 = vmatprep.subr.bf16.mxu0 %v1019_v41 }
  0x30   :  { %1160 = vrot.lane.b32.xlu0 %v1159_v51, %s1263_s5  ;;  %v188_v51 = vrot.slane %v1498_v23, 3  ;;  %1042 = vmatprep.subr.bf16.mxu1 %v1019_v41 }
  0x31   :  { %v109_v13 = vsel %vm66_vm1, %v106_v43, %v108_v50  ;;  %v110_v43 = vrot.slane %v1545_v62, 1  ;;  %1022 = vmatpush3.bf16.msra.mxu0 %v1019_v41 }
  0x32   :  { %v189_v42 = vsel %vm168_vm0, %v186_v52, %v188_v51  ;;  %v160_v52 = vsel %vm117_vm2, %v157_v19, %v159_v28  ;;  %v1027_v19 = vpack.c.bf16 %v524_v5, %v523_v49  ;;  %1050 = vmatpush3.bf16.msra.mxu1 %v1019_v41  ;;  %v528_v41 = vld [vmem:[%s1892_s1 + $0x78] sm:$0xff] }
  0x33   :  { %1175 = vrot.lane.b32.xlu1 %v1174_v31, %s1265_s11  ;;  %v522_v31 = vld [vmem:[%s1892_s1 + $0x48] sm:$0xff]  ;;  %v1189_v55 = vpack.i.bf16 %v209_v33, %v189_v42  ;;  %v1204_v16 = vpack.i.bf16 %v160_v52, %v140_v56 }
  0x34   :  { %1170 = vrot.lane.b32.xlu0 %v1169_v37, %s1264_s6  ;;  %v1194_v37 = vpack.i.bf16 %v109_v13, %v89_v12  ;;  %v1023_v3 = vpack.c.bf16 %v522_v31, %v521_v29  ;;  %v191_v13 = vsel %vm168_vm0, %v188_v51, %v190_v54  ;;  %v211_v29 = vsel %vm168_vm0, %v208_v8, %v210_v14 }
  0x35   :  { %v112_v31 = vrot.slane %v1550_v63, 1  ;;  %v1214_v51 = vpack.i.bf16 %v211_v29, %v191_v13 }
  0x36   :  { %1024 = vmatprep.subr.bf16.mxu0 %v1023_v3  ;;  %1043 = vmatprep.subr.bf16.mxu1 %v1023_v3 }
  0x37   :  { %1185 = vrot.lane.b32.xlu1 %v1184_v18, %s1263_s5  ;;  %v91_v18 = vsel %vm66_vm1, %v88_v35, %v90_v15  ;;  %v525_v15 = vld [vmem:[%s1892_s1 + $0x60] sm:$0xff]  ;;  %v526_v35 = vld [vmem:[%s1892_s1 + $0x68] sm:$0xff]  ;;  %1026 = vmatpush3.bf16.msra.mxu0 %v1023_v3  ;;  %v113_v33 = vsel %vm66_vm1, %v110_v43, %v112_v31  ;;  %v116_v30 = vsel %vm66_vm1, %v112_v31, %v67_v6 }
  0x38   :  { %1180 = vrot.lane.b32.xlu0 %v1179_v32, %s1265_s11  ;;  %v111_v32 = vsel %vm66_vm1, %v108_v50, %v110_v43  ;;  %v162_v50 = vsel %vm117_vm2, %v159_v28, %v161_v4  ;;  %1028 = vmatprep.subr.bf16.mxu0 %v1027_v19  ;;  %v1031_v8 = vpack.c.bf16 %v526_v35, %v525_v15  ;;  %v527_v4 = vld [vmem:[%s1892_s1 + $0x70] sm:$0xff] }
  0x39   :  { %v1199_v12 = vpack.i.bf16 %v111_v32, %v91_v18  ;;  %v1209_v42 = vpack.i.bf16 %v162_v50, %v142_v53  ;;  %v213_v28 = vsel %vm168_vm0, %v210_v14, %v212_v20  ;;  %1051 = vmatpush3.bf16.msra.mxu1 %v1023_v3  ;;  %v1224_v6 = vpack.i.bf16 %v116_v30, %v113_v33 }
  0x3a   :  { %1044 = vmatprep.subr.bf16.mxu1 %v1027_v19  ;;  %v1035_v43 = vpack.c.bf16 %v528_v41, %v527_v4 }
  0x3b   :  { %1195 = vrot.lane.b32.xlu1 %v1194_v37, %s1264_s6  ;;  %1030 = vmatpush3.bf16.msra.mxu0 %v1027_v19  ;;  %v1219_v37 = vpack.i.bf16 %v213_v28, %v193_v9 }
  0x3c   :  { %1190 = vrot.lane.b32.xlu0 %v1189_v55, %s1263_s5  ;;  %1032 = vmatprep.subr.bf16.mxu0 %v1031_v8 }
  0x3d   :  { %1052 = vmatpush3.bf16.msra.mxu1 %v1027_v19 }
  0x3e   :  { %1045 = vmatprep.subr.bf16.mxu1 %v1031_v8 }
  0x3f   :  { %1205 = vrot.lane.b32.xlu1 %v1204_v16, %s1265_s11  ;;  %1034 = vmatpush3.bf16.msra.mxu0 %v1031_v8 }
  0x40   :  { %1200 = vrot.lane.b32.xlu0 %v1199_v12, %s1264_s6  ;;  %1036 = vmatprep.subr.bf16.mxu0 %v1035_v43 }
  0x41   :  { %1053 = vmatpush3.bf16.msra.mxu1 %v1031_v8 }
  0x42   :  { %1046 = vmatprep.subr.bf16.mxu1 %v1035_v43 }
  0x43   :  { %1215 = vrot.lane.b32.xlu1 %v1214_v51, %s1263_s5  ;;  %1038 = vmatpush3.bf16.msra.mxu0 %v1035_v43 }
  0x44   :  { %1210 = vrot.lane.b32.xlu0 %v1209_v42, %s1265_s11 }
  0x45   :  { %1054 = vmatpush3.bf16.msra.mxu1 %v1035_v43 }
  0x47   :  { %1225 = vrot.lane.b32.xlu1 %v1224_v6, %s1264_s6 }
  0x48   :  { %1220 = vrot.lane.b32.xlu0 %v1219_v37, %s1263_s5 }
  0x4b   :  { %1235 = vrot.lane.b32.xlu1 %v1234_v25, %s1263_s5 }
  0x4c   :  { %1230 = vrot.lane.b32.xlu0 %v1229_v48, %s1265_s11 }
  0x79   :  { %v1071_v38 = vpop.permute.xlu1 %1070 }
  0x7a   :  { %v1061_v20 = vpop.permute.xlu0 %1060  ;;  %v1073_v49 = vunpack.i.h.bf16 %v1071_v38  ;;  %v1072_v17 = vunpack.i.l.bf16 %v1071_v38 }
  0x7b   :  { %v1063_v54 = vunpack.i.h.bf16 %v1061_v20  ;;  %v1062_v3 = vunpack.i.l.bf16 %v1061_v20 }
  0x7d   :  { %v1076_v55 = vpop.permute.xlu1 %1075  ;;  %v439_v47 = vsel %vm438_vm3, %v1295_v0, %v1062_v3  ;;  %v440_v36 = vsel %vm438_vm3, %v1300_v1, %v1063_v54 }
  0x7e   :  { %v1066_v56 = vpop.permute.xlu0 %1065  ;;  %v1078_v5 = vunpack.i.h.bf16 %v1076_v55  ;;  %v1077_v18 = vunpack.i.l.bf16 %v1076_v55 }
  0x7f   :  { %v1068_v52 = vunpack.i.h.bf16 %v1066_v56  ;;  %v1067_v14 = vunpack.i.l.bf16 %v1066_v56 }
  0x80   :  { %v451_v15 = vsel %vm438_vm3, %v1321_v10, %v1078_v5  ;;  %v441_v35 = vsel %vm438_vm3, %v1305_v2, %v1077_v18 }
  0x81   :  { %v1086_v46 = vpop.permute.xlu1 %1085  ;;  %v464_v48 = vsel %vm463_vm4, %v439_v47, %v1067_v14  ;;  %v465_v25 = vsel %vm463_vm4, %v440_v36, %v1068_v52 }
  0x82   :  { %v1081_v32 = vpop.permute.xlu0 %1080  ;;  %v489_v16 = vsel %vm488_vm5, %v464_v48, %v1072_v17  ;;  %v490_v19 = vsel %vm488_vm5, %v465_v25, %v1073_v49  ;;  %v1088_v12 = vunpack.i.h.bf16 %v1086_v46  ;;  %v1087_v13 = vunpack.i.l.bf16 %v1086_v46 }
  0x83   :  { %971 = vmatprep.mubr.f32.mxu0 %v489_v16  ;;  %v1083_v53 = vunpack.i.h.bf16 %v1081_v32  ;;  %v1082_v50 = vunpack.i.l.bf16 %v1081_v32 }
  0x84   :  { %972 = vmatmul.mubr.f32.vlgmr.msra.gmra.mrb[0].mxu0 %v490_v19  ;;  %v476_v51 = vsel %vm463_vm4, %v451_v15, %v1088_v12  ;;  %v466_v8 = vsel %vm463_vm4, %v441_v35, %v1087_v13 }
  0x85   :  { %v1096_v0 = vpop.permute.xlu1 %1095  ;;  %v442_v2 = vsel %vm438_vm3, %v1314_v7, %v1082_v50  ;;  %v452_v6 = vsel %vm438_vm3, %v1326_v11, %v1083_v53 }
  0x86   :  { %v1098_v29 = vunpack.i.h.bf16 %v1096_v0  ;;  %v1097_v31 = vunpack.i.l.bf16 %v1096_v0  ;;  %v1091_v1 = vpop.permute.xlu0 %1090 }
  0x87   :  { %v1093_v42 = vunpack.i.h.bf16 %v1091_v1  ;;  %v1092_v33 = vunpack.i.l.bf16 %v1091_v1 }
  0x88   :  { %v501_v30 = vsel %vm488_vm5, %v476_v51, %v1098_v29  ;;  %v491_v4 = vsel %vm488_vm5, %v466_v8, %v1097_v31 }
  0x89   :  { %v1106_v41 = vpop.permute.xlu1 %1105  ;;  %989 = vmatprep.mubr.f32.mxu1 %v501_v30  ;;  %974 = vmatprep.mubr.f32.mxu0 %v491_v4  ;;  %v467_v43 = vsel %vm463_vm4, %v442_v2, %v1092_v33  ;;  %v477_v37 = vsel %vm463_vm4, %v452_v6, %v1093_v42 }
  0x8a   :  { %v1101_v9 = vpop.permute.xlu0 %1100  ;;  %v1108_v3 = vunpack.i.h.bf16 %v1106_v41  ;;  %v1107_v55 = vunpack.i.l.bf16 %v1106_v41 }
  0x8b   :  { %v1103_v10 = vunpack.i.h.bf16 %v1101_v9  ;;  %v1102_v28 = vunpack.i.l.bf16 %v1101_v9 }
  0x8c   :  { %v443_v47 = vsel %vm438_vm3, %v1343_v21, %v1107_v55  ;;  %v453_v36 = vsel %vm438_vm3, %v1348_v22, %v1108_v3 }
  0x8d   :  { %v1116_v38 = vpop.permute.xlu1 %1115  ;;  %v492_v20 = vsel %vm488_vm5, %v467_v43, %v1102_v28  ;;  %v502_v54 = vsel %vm488_vm5, %v477_v37, %v1103_v10 }
  0x8e   :  { %v1111_v56 = vpop.permute.xlu0 %1110  ;;  %975 = vmatmul.mubr.f32.gmra.mrb[2].mxu0 %v492_v20  ;;  %990 = vmatmul.mubr.f32.vlgmr.msra.gmra.mrb[0].mxu1 %v502_v54  ;;  %v1118_v52 = vunpack.i.h.bf16 %v1116_v38  ;;  %v1117_v14 = vunpack.i.l.bf16 %v1116_v38 }
  0x8f   :  { %v1113_v46 = vunpack.i.h.bf16 %v1111_v56  ;;  %v1112_v48 = vunpack.i.l.bf16 %v1111_v56 }
  0x90   :  { %v468_v25 = vsel %vm463_vm4, %v443_v47, %v1117_v14  ;;  %v478_v5 = vsel %vm463_vm4, %v453_v36, %v1118_v52 }
  0x91   :  { %v1126_v7 = vpop.permute.xlu1 %1125  ;;  %v444_v22 = vsel %vm438_vm3, %v1373_v39, %v1112_v48  ;;  %v454_v29 = vsel %vm438_vm3, %v1378_v40, %v1113_v46 }
  0x92   :  { %v1128_v49 = vunpack.i.h.bf16 %v1126_v7  ;;  %v1127_v17 = vunpack.i.l.bf16 %v1126_v7  ;;  %v1121_v11 = vpop.permute.xlu0 %1120 }
  0x93   :  { %v1123_v18 = vunpack.i.h.bf16 %v1121_v11  ;;  %v1122_v32 = vunpack.i.l.bf16 %v1121_v11 }
  0x94   :  { %v493_v16 = vsel %vm488_vm5, %v468_v25, %v1127_v17  ;;  %v503_v19 = vsel %vm488_vm5, %v478_v5, %v1128_v49 }
  0x95   :  { %v1136_v12 = vpop.permute.xlu1 %1135  ;;  %977 = vmatprep.mubr.f32.mxu0 %v493_v16  ;;  %992 = vmatprep.mubr.f32.mxu1 %v503_v19  ;;  %v469_v31 = vsel %vm463_vm4, %v444_v22, %v1122_v32  ;;  %v479_v1 = vsel %vm463_vm4, %v454_v29, %v1123_v18 }
  0x96   :  { %v1131_v13 = vpop.permute.xlu0 %1130  ;;  %v1138_v50 = vunpack.i.h.bf16 %v1136_v12  ;;  %v1137_v51 = vunpack.i.l.bf16 %v1136_v12 }
  0x97   :  { %v1133_v21 = vunpack.i.h.bf16 %v1131_v13  ;;  %v1132_v0 = vunpack.i.l.bf16 %v1131_v13 }
  0x98   :  { %v445_v41 = vsel %vm438_vm3, %v1404_v59, %v1137_v51  ;;  %v455_v9 = vsel %vm438_vm3, %v1409_v60, %v1138_v50 }
  0x99   :  { %v1146_v15 = vpop.permute.xlu1 %1145  ;;  %v494_v35 = vsel %vm488_vm5, %v469_v31, %v1132_v0  ;;  %v504_v53 = vsel %vm488_vm5, %v479_v1, %v1133_v21 }
  0x9a   :  { %v1141_v8 = vpop.permute.xlu0 %1140  ;;  %978 = vmatmul.mubr.f32.gmra.mrb[4].mxu0 %v494_v35  ;;  %993 = vmatmul.mubr.f32.gmra.mrb[2].mxu1 %v504_v53  ;;  %v1148_v42 = vunpack.i.h.bf16 %v1146_v15  ;;  %v1147_v33 = vunpack.i.l.bf16 %v1146_v15 }
  0x9b   :  { %v1143_v10 = vunpack.i.h.bf16 %v1141_v8  ;;  %v1142_v28 = vunpack.i.l.bf16 %v1141_v8 }
  0x9c   :  { %v470_v2 = vsel %vm463_vm4, %v445_v41, %v1147_v33  ;;  %v480_v6 = vsel %vm463_vm4, %v455_v9, %v1148_v42 }
  0x9d   :  { %v1156_v39 = vpop.permute.xlu1 %1155  ;;  %v446_v60 = vsel %vm438_vm3, %v1430_v24, %v1142_v28  ;;  %v456_v56 = vsel %vm438_vm3, %v1436_v27, %v1143_v10 }
  0x9e   :  { %v1158_v30 = vunpack.i.h.bf16 %v1156_v39  ;;  %v1157_v4 = vunpack.i.l.bf16 %v1156_v39  ;;  %v1151_v40 = vpop.permute.xlu0 %1150 }
  0x9f   :  { %v1153_v43 = vunpack.i.h.bf16 %v1151_v40  ;;  %v1152_v37 = vunpack.i.l.bf16 %v1151_v40 }
  0xa0   :  { %v495_v38 = vsel %vm488_vm5, %v470_v2, %v1157_v4  ;;  %v505_v20 = vsel %vm488_vm5, %v480_v6, %v1158_v30 }
  0xa1   :  { %v1166_v54 = vpop.permute.xlu1 %1165  ;;  %980 = vmatprep.mubr.f32.mxu0 %v495_v38  ;;  %995 = vmatprep.mubr.f32.mxu1 %v505_v20  ;;  %v471_v52 = vsel %vm463_vm4, %v446_v60, %v1152_v37  ;;  %v481_v14 = vsel %vm463_vm4, %v456_v56, %v1153_v43 }
  0xa2   :  { %v1161_v3 = vpop.permute.xlu0 %1160  ;;  %v1168_v11 = vunpack.i.h.bf16 %v1166_v54  ;;  %v1167_v47 = vunpack.i.l.bf16 %v1166_v54 }
  0xa3   :  { %v1163_v59 = vunpack.i.h.bf16 %v1161_v3  ;;  %v1162_v55 = vunpack.i.l.bf16 %v1161_v3 }
  0xa4   :  { %v447_v18 = vsel %vm438_vm3, %v1453_v44, %v1167_v47  ;;  %v457_v32 = vsel %vm438_vm3, %v1458_v45, %v1168_v11 }
  0xa5   :  { %v1176_v7 = vpop.permute.xlu1 %1175  ;;  %v496_v49 = vsel %vm488_vm5, %v471_v52, %v1162_v55  ;;  %v506_v17 = vsel %vm488_vm5, %v481_v14, %v1163_v59 }
  0xa6   :  { %v1171_v36 = vpop.permute.xlu0 %1170  ;;  %981 = vmatmul.mubr.f32.gmra.mrb[6].mxu0 %v496_v49  ;;  %996 = vmatmul.mubr.f32.gmra.mrb[4].mxu1 %v506_v17  ;;  %v1178_v46 = vunpack.i.h.bf16 %v1176_v7  ;;  %v1177_v48 = vunpack.i.l.bf16 %v1176_v7 }
  0xa7   :  { %v1173_v16 = vunpack.i.h.bf16 %v1171_v36  ;;  %v1172_v19 = vunpack.i.l.bf16 %v1171_v36 }
  0xa8   :  { %v472_v12 = vsel %vm463_vm4, %v447_v18, %v1177_v48  ;;  %v482_v13 = vsel %vm463_vm4, %v457_v32, %v1178_v46 }
  0xa9   :  { %v1186_v24 = vpop.permute.xlu1 %1185  ;;  %v448_v45 = vsel %vm438_vm3, %v1474_v57, %v1172_v19  ;;  %v458_v35 = vsel %vm438_vm3, %v1479_v58, %v1173_v16  ;;  %v1805_v16 = vld [vmem:[%s1894_s3 + $0x8] sm:$0xff] }
  0xaa   :  { %v1188_v25 = vunpack.i.h.bf16 %v1186_v24  ;;  %v1187_v5 = vunpack.i.l.bf16 %v1186_v24  ;;  %v1181_v27 = vpop.permute.xlu0 %1180 }
  0xab   :  { %v1183_v21 = vunpack.i.h.bf16 %v1181_v27  ;;  %v1182_v0 = vunpack.i.l.bf16 %v1181_v27 }
  0xac   :  { %v497_v22 = vsel %vm488_vm5, %v472_v12, %v1187_v5  ;;  %v507_v29 = vsel %vm488_vm5, %v482_v13, %v1188_v25 }
  0xad   :  { %v1196_v31 = vpop.permute.xlu1 %1195  ;;  %983 = vmatprep.mubr.f32.mxu0 %v497_v22  ;;  %998 = vmatprep.mubr.f32.mxu1 %v507_v29  ;;  %v473_v53 = vsel %vm463_vm4, %v448_v45, %v1182_v0  ;;  %v483_v50 = vsel %vm463_vm4, %v458_v35, %v1183_v21  ;;  %v1819_v29 = vld [vmem:[%s1894_s3 + $0x10] sm:$0xff] }
  0xae   :  { %v1191_v1 = vpop.permute.xlu0 %1190  ;;  %v1198_v33 = vunpack.i.h.bf16 %v1196_v31  ;;  %v1197_v39 = vunpack.i.l.bf16 %v1196_v31 }
  0xaf   :  { %v1193_v44 = vunpack.i.h.bf16 %v1191_v1  ;;  %v1192_v15 = vunpack.i.l.bf16 %v1191_v1 }
  0xb0   :  { %v449_v10 = vsel %vm438_vm3, %v1498_v23, %v1197_v39  ;;  %v459_v28 = vsel %vm438_vm3, %v1503_v26, %v1198_v33 }
  0xb1   :  { %v1206_v51 = vpop.permute.xlu1 %1205  ;;  %v498_v8 = vsel %vm488_vm5, %v473_v53, %v1192_v15  ;;  %v508_v42 = vsel %vm488_vm5, %v483_v50, %v1193_v44 }
  0xb2   :  { %v1201_v30 = vpop.permute.xlu0 %1200  ;;  %984 = vmatmul.mubr.f32.gmra.mrb[8].mxu0 %v498_v8  ;;  %999 = vmatmul.mubr.f32.gmra.mrb[6].mxu1 %v508_v42  ;;  %v1208_v4 = vunpack.i.h.bf16 %v1206_v51  ;;  %v1207_v40 = vunpack.i.l.bf16 %v1206_v51 }
  0xb3   :  { %v1203_v2 = vunpack.i.h.bf16 %v1201_v30  ;;  %v1202_v6 = vunpack.i.l.bf16 %v1201_v30 }
  0xb4   :  { %v474_v43 = vsel %vm463_vm4, %v449_v10, %v1207_v40  ;;  %v484_v37 = vsel %vm463_vm4, %v459_v28, %v1208_v4 }
  0xb5   :  { %v1216_v57 = vpop.permute.xlu1 %1215  ;;  %v450_v26 = vsel %vm438_vm3, %v1540_v61, %v1202_v6  ;;  %v460_v56 = vsel %vm438_vm3, %v1579_v34, %v1203_v2 }
  0xb6   :  { %v1218_v41 = vunpack.i.h.bf16 %v1216_v57  ;;  %v1217_v9 = vunpack.i.l.bf16 %v1216_v57  ;;  %v1211_v58 = vpop.permute.xlu0 %1210 }
  0xb7   :  { %v1213_v38 = vunpack.i.h.bf16 %v1211_v58  ;;  %v1212_v20 = vunpack.i.l.bf16 %v1211_v58 }
  0xb8   :  { %v499_v54 = vsel %vm488_vm5, %v474_v43, %v1217_v9  ;;  %v509_v3 = vsel %vm488_vm5, %v484_v37, %v1218_v41 }
  0xb9   :  { %986 = vmatprep.mubr.f32.mxu0 %v499_v54  ;;  %1001 = vmatprep.mubr.f32.mxu1 %v509_v3  ;;  %v1226_v59 = vpop.permute.xlu1 %1225  ;;  %v475_v7 = vsel %vm463_vm4, %v450_v26, %v1212_v20  ;;  %v485_v49 = vsel %vm463_vm4, %v460_v56, %v1213_v38 }
  0xba   :  { %v1221_v55 = vpop.permute.xlu0 %1220  ;;  %v1228_v52 = vunpack.i.h.bf16 %v1226_v59  ;;  %v1227_v14 = vunpack.i.l.bf16 %v1226_v59 }
  0xbb   :  { %v1223_v23 = vunpack.i.h.bf16 %v1221_v55  ;;  %v1222_v60 = vunpack.i.l.bf16 %v1221_v55 }
  0xbc   :  { %v461_v34 = vsel %vm438_vm3, %v1545_v62, %v1227_v14  ;;  %v462_v25 = vsel %vm438_vm3, %v1550_v63, %v1228_v52  ;;  %v1810_v62 = vld [vmem:[%s1894_s3] sm:$0xff] }
  0xbd   :  { %v500_v17 = vsel %vm488_vm5, %v475_v7, %v1222_v60  ;;  %v510_v11 = vsel %vm488_vm5, %v485_v49, %v1223_v23  ;;  %v1236_v47 = vpop.permute.xlu1 %1235 }
  0xbe   :  { %v1231_v36 = vpop.permute.xlu0 %1230  ;;  %987 = vmatmul.mubr.f32.gmra.mrb[10].mxu0 %v500_v17  ;;  %1002 = vmatmul.mubr.f32.gmra.mrb[8].mxu1 %v510_v11  ;;  %v1238_v46 = vunpack.i.h.bf16 %v1236_v47  ;;  %v1237_v48 = vunpack.i.l.bf16 %v1236_v47 }
  0xbf   :  { %v1233_v61 = vunpack.i.h.bf16 %v1231_v36  ;;  %v1232_v24 = vunpack.i.l.bf16 %v1231_v36 }
  0xc1   :  { %v486_v5 = vsel %vm463_vm4, %v461_v34, %v1232_v24  ;;  %v487_v27 = vsel %vm463_vm4, %v462_v25, %v1233_v61 }
  0xc2   :  { %v511_v18 = vsel %vm488_vm5, %v486_v5, %v1237_v48  ;;  %v512_v32 = vsel %vm488_vm5, %v487_v27, %v1238_v46 }
  0xc3   :  { %1004 = vmatprep.mubr.f32.mxu1 %v511_v18 }
  0xc4   :  { %1005 = vmatmul.mubr.f32.gmra.mrb[10].mxu1 %v512_v32  ;;  %v1847_v32 = vld [vmem:[%s1893_s2] ss:$0 sm:$0xff]  ;;  %s1266_s2 = smov [#allocation2]  }
  0xc5   :  { %s890_s28 = sshll.u32 %s1266_s2, 4  ;;  %s891_s28 = int_to_ptr.vmem [resolvable:$true] %s890_s28 }
  0xc6   :  { %s1239_s0 = scalar_lea.vmem %s891_s28, 128  ;;  %p1244_p1 = scmp.lt.s32.totalorder %s891_s28, %s891_s28 }
  0xc7   :  { %p1240_p0 = scmp.ne.s32.totalorder %s891_s28, %s1239_s0  ;;  %p1245_p2 = scmp.lt.s32.totalorder %s1239_s0, %s1239_s0 }
  0xc9   :  { %p1246_p3 = por %p1245_p2, %p1244_p1 }
  0xcb   :  { %p1247_p4 = pnand %p1246_p3, %p1240_p0 }
 0x157   :  { %v973_v63 = vpop.f32.mrb[0].mxu0 }
 0x158   :  { %v718_v19 = vadd.f32 %v973_v63, %v1805_v16  ;;  %v595_v12 = vpop.f32.mrb[1].mxu0 }
 0x159   :  { %v717_v13 = vadd.f32 %v1810_v62, %v595_v12 }
 0x15a   :  { %v743_v21 = vsel %vm741_vm6, %v718_v19, -inf }
 0x15b   :  { %v742_v0 = vsel %vm741_vm6, %v717_v13, -inf }
 0x15c   :  { %v744_v22 = vmax.f32 %v742_v0, %v743_v21 }
 0x161   :  { %v976_v31 = vpop.f32.mrb[2].mxu0  ;;  %v991_v1 = vpop.f32.mrb[0].mxu1 }
 0x162   :  { %v730_v44 = vadd.f32 %v991_v1, %v1805_v16  ;;  %v605_v15 = vpop.f32.mrb[3].mxu0  ;;  %v655_v45 = vpop.f32.mrb[1].mxu1  ;;  %v720_v30 = vadd.f32 %v976_v31, %v1810_v62 }
 0x163   :  { %v719_v35 = vadd.f32 %v1819_v29, %v605_v15  ;;  %v729_v53 = vadd.f32 %v1810_v62, %v655_v45 }
 0x164   :  { %v787_v50 = vsel %vm741_vm6, %v730_v44, -inf  ;;  %v753_v2 = vsel %vm741_vm6, %v720_v30, -inf }
 0x165   :  { %v745_v51 = vsel %vm741_vm6, %v719_v35, -inf  ;;  %v786_v8 = vsel %vm741_vm6, %v729_v53, -inf }
 0x166   :  { %v746_v42 = vmax.f32 %v744_v22, %v745_v51  ;;  %v788_v33 = vmax.f32 %v786_v8, %v787_v50 }
 0x168   :  { %v747_v39 = vrot.slane %v746_v42, 4 }
 0x16a   :  { %v748_v57 = vmax.f32 %v746_v42, %v747_v39 }
 0x16c   :  { %v749_v37 = vrot.slane %v748_v57, 2 }
 0x16d   :  { %v979_v4 = vpop.f32.mrb[4].mxu0  ;;  %v994_v40 = vpop.f32.mrb[2].mxu1 }
 0x16e   :  { %v615_v41 = vpop.f32.mrb[5].mxu0  ;;  %v665_v9 = vpop.f32.mrb[3].mxu1  ;;  %v722_v58 = vadd.f32 %v979_v4, %v1819_v29  ;;  %v750_v59 = vmax.f32 %v748_v57, %v749_v37  ;;  %v732_v60 = vadd.f32 %v994_v40, %v1810_v62 }
 0x16f   :  { %v721_v10 = vadd.f32 %v1805_v16, %v615_v41  ;;  %v731_v28 = vadd.f32 %v1819_v29, %v665_v9 }
 0x170   :  { %v756_v54 = vsel %vm741_vm6, %v722_v58, -inf  ;;  %v751_v52 = vrot.slane %v750_v59, 1  ;;  %v797_v61 = vsel %vm741_vm6, %v732_v60, -inf }
 0x171   :  { %v754_v6 = vsel %vm741_vm6, %v721_v10, -inf  ;;  %v789_v43 = vsel %vm741_vm6, %v731_v28, -inf }
 0x172   :  { %v755_v38 = vmax.f32 %v753_v2, %v754_v6  ;;  %v790_v20 = vmax.f32 %v788_v33, %v789_v43  ;;  %v752_v25 = vmax.f32 %v750_v59, %v751_v52 }
 0x174   :  { %v757_v3 = vmax.f32 %v755_v38, %v756_v54  ;;  %v837_v13 = vadd.f32 %v1847_v32, %v752_v25  ;;  %v791_v39 = vrot.slane %v790_v20, 4 }
 0x176   :  { %v758_v55 = vrot.slane %v757_v3, 4  ;;  %v845_v1 = vmax.f32 %v837_v13, 0.0  ;;  %v792_v41 = vmax.f32 %v790_v20, %v791_v39 }
 0x178   :  { %v759_v23 = vmax.f32 %v757_v3, %v758_v55  ;;  %v793_v43 = vrot.slane %v792_v41, 2 }
 0x179   :  { %v982_v26 = vpop.f32.mrb[6].mxu0  ;;  %v997_v56 = vpop.f32.mrb[4].mxu1 }
 0x17a   :  { %v760_v14 = vrot.slane %v759_v23, 2  ;;  %v724_v7 = vadd.f32 %v982_v26, %v1805_v16  ;;  %v625_v49 = vpop.f32.mrb[7].mxu0  ;;  %v675_v17 = vpop.f32.mrb[5].mxu1  ;;  %v734_v11 = vadd.f32 %v997_v56, %v1819_v29 }
 0x17b   :  { %v723_v47 = vadd.f32 %v1810_v62, %v625_v49  ;;  %v733_v36 = vadd.f32 %v1805_v16, %v675_v17  ;;  %v794_v49 = vmax.f32 %v792_v41, %v793_v43 }
 0x17c   :  { %v761_v46 = vmax.f32 %v759_v23, %v760_v14  ;;  %v765_v48 = vsel %vm741_vm6, %v724_v7, -inf  ;;  %v800_v63 = vsel %vm741_vm6, %v734_v11, -inf }
 0x17d   :  { %v764_v24 = vsel %vm741_vm6, %v723_v47, -inf  ;;  %v798_v34 = vsel %vm741_vm6, %v733_v36, -inf }
 0x17e   :  { %v762_v5 = vrot.slane %v761_v46, 1  ;;  %v766_v27 = vmax.f32 %v764_v24, %v765_v48  ;;  %v799_v18 = vmax.f32 %v797_v61, %v798_v34 }
 0x180   :  { %v763_v19 = vmax.f32 %v761_v46, %v762_v5  ;;  %v801_v12 = vmax.f32 %v799_v18, %v800_v63  ;;  %v795_v63 = vrot.slane %v794_v49, 1 }
 0x182   :  { %v838_v21 = vadd.f32 %v1847_v32, %v763_v19  ;;  %v802_v40 = vrot.slane %v801_v12, 4 }
 0x184   :  { %v846_v0 = vmax.f32 %v838_v21, 0.0  ;;  %v803_v58 = vmax.f32 %v801_v12, %v802_v40 }
 0x185   :  { %v985_v22 = vpop.f32.mrb[8].mxu0  ;;  %v1000_v31 = vpop.f32.mrb[6].mxu1 }
 0x186   :  { %v861_v44 = vrot.slane %v846_v0, 7  ;;  %v736_v15 = vadd.f32 %v1000_v31, %v1805_v16  ;;  %v635_v45 = vpop.f32.mrb[9].mxu0  ;;  %v685_v35 = vpop.f32.mrb[7].mxu1  ;;  %v726_v28 = vadd.f32 %v985_v22, %v1810_v62  ;;  %v804_v3 = vrot.slane %v803_v58, 2 }
 0x187   :  { %v725_v53 = vadd.f32 %v1819_v29, %v635_v45  ;;  %v735_v50 = vadd.f32 %v1810_v62, %v685_v35 }
 0x188   :  { %v809_v51 = vsel %vm741_vm6, %v736_v15, -inf  ;;  %v863_v8 = vsel %vm862_vm7, %v861_v44, %v845_v1  ;;  %v775_v20 = vsel %vm741_vm6, %v726_v28, -inf  ;;  %v805_v17 = vmax.f32 %v803_v58, %v804_v3 }
 0x189   :  { %v767_v42 = vsel %vm741_vm6, %v725_v53, -inf  ;;  %v808_v33 = vsel %vm741_vm6, %v735_v50, -inf  ;;  %v796_v15 = vmax.f32 %v794_v49, %v795_v63 }
 0x18a   :  { %v768_v30 = vmax.f32 %v766_v27, %v767_v42  ;;  %v810_v4 = vmax.f32 %v808_v33, %v809_v51  ;;  %v806_v19 = vrot.slane %v805_v17, 1 }
 0x18b   :  { %v841_v39 = vadd.f32 %v1847_v32, %v796_v15 }
 0x18c   :  { %v769_v57 = vrot.slane %v768_v30, 4  ;;  %v807_v45 = vmax.f32 %v805_v17, %v806_v19 }
 0x18e   :  { %v770_v9 = vmax.f32 %v768_v30, %v769_v57  ;;  %v842_v40 = vadd.f32 %v1847_v32, %v807_v45 }
 0x190   :  { %v771_v10 = vrot.slane %v770_v9, 2  ;;  %v850_v28 = vmax.f32 %v842_v40, 0.0 }
 0x191   :  { %v988_v2 = vpop.f32.mrb[10].mxu0  ;;  %v1003_v6 = vpop.f32.mrb[8].mxu1 }
 0x192   :  { %v772_v37 = vmax.f32 %v770_v9, %v771_v10  ;;  %v645_v38 = vpop.f32.mrb[11].mxu0  ;;  %v695_v54 = vpop.f32.mrb[9].mxu1  ;;  %v728_v59 = vadd.f32 %v988_v2, %v1819_v29  ;;  %v738_v47 = vadd.f32 %v1003_v6, %v1810_v62  ;;  %v873_v3 = vrot.slane %v850_v28, 3 }
 0x193   :  { %v727_v55 = vadd.f32 %v1805_v16, %v645_v38  ;;  %v737_v23 = vadd.f32 %v1819_v29, %v695_v54 }
 0x194   :  { %v773_v60 = vrot.slane %v772_v37, 1  ;;  %v778_v11 = vsel %vm741_vm6, %v728_v59, -inf  ;;  %v819_v12 = vsel %vm741_vm6, %v738_v47, -inf }
 0x195   :  { %v776_v26 = vsel %vm741_vm6, %v727_v55, -inf  ;;  %v811_v56 = vsel %vm741_vm6, %v737_v23, -inf }
 0x196   :  { %v774_v52 = vmax.f32 %v772_v37, %v773_v60  ;;  %v777_v14 = vmax.f32 %v775_v20, %v776_v26  ;;  %v812_v7 = vmax.f32 %v810_v4, %v811_v56 }
 0x197   :  { %v1006_v36 = vpop.f32.mrb[10].mxu1 }
 0x198   :  { %v839_v46 = vadd.f32 %v1847_v32, %v774_v52  ;;  %v779_v48 = vmax.f32 %v777_v14, %v778_v11  ;;  %v813_v61 = vrot.slane %v812_v7, 4  ;;  %v705_v24 = vpop.f32.mrb[11].mxu1  ;;  %v740_v34 = vadd.f32 %v1006_v36, %v1819_v29 }
 0x199   :  { %v739_v25 = vadd.f32 %v1805_v16, %v705_v24 }
 0x19a   :  { %v847_v5 = vmax.f32 %v839_v46, 0.0  ;;  %v780_v27 = vrot.slane %v779_v48, 4  ;;  %v814_v18 = vmax.f32 %v812_v7, %v813_v61  ;;  %v822_v31 = vsel %vm741_vm6, %v740_v34, -inf }
 0x19b   :  { %v820_v62 = vsel %vm741_vm6, %v739_v25, -inf }
 0x19c   :  { %v864_v13 = vrot.slane %v847_v5, 6  ;;  %v781_v21 = vmax.f32 %v779_v48, %v780_v27  ;;  %v815_v0 = vrot.slane %v814_v18, 2  ;;  %v821_v22 = vmax.f32 %v819_v12, %v820_v62 }
 0x19e   :  { %v782_v1 = vrot.slane %v781_v21, 2  ;;  %v816_v29 = vmax.f32 %v814_v18, %v815_v0  ;;  %v823_v44 = vmax.f32 %v821_v22, %v822_v31  ;;  %v866_v16 = vsel %vm865_vm8, %v864_v13, %v863_v8 }
 0x19f   :  { %v849_v8 = vmax.f32 %v841_v39, 0.0 }
 0x1a0   :  { %v783_v35 = vmax.f32 %v781_v21, %v782_v1  ;;  %v817_v53 = vrot.slane %v816_v29, 1  ;;  %v824_v50 = vrot.slane %v823_v44, 4 }
 0x1a1   :  { %v870_v37 = vrot.slane %v849_v8, 4 }
 0x1a2   :  { %v784_v51 = vrot.slane %v783_v35, 1  ;;  %v818_v42 = vmax.f32 %v816_v29, %v817_v53  ;;  %v825_v33 = vmax.f32 %v823_v44, %v824_v50 }
 0x1a4   :  { %v785_v30 = vmax.f32 %v783_v35, %v784_v51  ;;  %v826_v4 = vrot.slane %v825_v33, 2  ;;  %v843_v57 = vadd.f32 %v1847_v32, %v818_v42 }
 0x1a6   :  { %v840_v41 = vadd.f32 %v1847_v32, %v785_v30  ;;  %v827_v9 = vmax.f32 %v825_v33, %v826_v4  ;;  %v851_v2 = vmax.f32 %v843_v57, 0.0 }
 0x1a8   :  { %v848_v58 = vmax.f32 %v840_v41, 0.0  ;;  %v828_v10 = vrot.slane %v827_v9, 1  ;;  %v876_v55 = vrot.slane %v851_v2, 2 }
 0x1aa   :  { %v867_v6 = vrot.slane %v848_v58, 5  ;;  %v829_v43 = vmax.f32 %v827_v9, %v828_v10 }
 0x1ac   :  { %v844_v38 = vadd.f32 %v1847_v32, %v829_v43  ;;  %v869_v54 = vsel %vm868_vm9, %v867_v6, %v866_v16 }
 0x1ad   :  { %v872_v59 = vsel %vm871_vm10, %v870_v37, %v869_v54 }
 0x1ae   :  { %v852_v23 = vmax.f32 %v844_v38, 0.0  ;;  %v875_v60 = vsel %vm874_vm11, %v873_v3, %v872_v59 }
 0x1af   :  { %v878_v20 = vsel %vm877_vm12, %v876_v55, %v875_v60 }
 0x1b0   :  { %v879_v26 = vrot.slane %v852_v23, 1 }
 0x1b2   :  { %v881_v56 = vsel %vm880_vm13, %v879_v26, %v878_v20 }
 0x1b3   :  { %883 = vst.msk [vmem:[#allocation2] sm:$0xff] %vm741_vm6, %v881_v56 }
 0x1b4   :  { %1250 = shalt.err (!%p1247_p4)
}
 0x1b5   :  { %s1251_s7 = scalar_lea.hbm %s1895_s4, 128 }
 0x1b6   :  { %p1252_p5 = scmp.ne.s32.totalorder %s1895_s4, %s1251_s7  ;;  %p1255_p6 = scmp.lt.u32.totalorder %s1251_s7, %s1895_s4 }
 0x1b8   :  { %p1257_p7 = pnand %p1255_p6, %p1252_p5 }
 0x1ba   :  { %1260 = shalt.err (!%p1257_p7)
}
 0x1bb   :  { %893 = dma.vmem_to_hbm [thread:$0]  %s891_s28, 128, %s1895_s4, [#allocation3]  }
 0x1bc   :  { %1261 = dma.done.wait [#allocation3], 128  }
 0x1bd   :  { %1262 = vsyncadd [#allocation3], 4294967168 }
 0x1be   :  { %897 = vsyncpa [#allocation3], 1 }

</bundles_post_ra>
